<compile_context>
chip_gen: v5e
topology: v5e:2x2
jax: 0.10.0
libtpu: 0.0.40
codegen_flags: <defaults>
</compile_context>

<pallas_src>
import functools

import jax
import jax.numpy as jnp
from jax import lax
from jax.experimental import pallas as pl
from jax.experimental.pallas import tpu as pltpu


_MAX_TILE_ROWS = 8192            # cap on batch-tile rows (multiple of 8)
_TARGET_TILE_BYTES = 4 << 20     # ~4 MiB per pipelined sample buffer
_SLAB_ROWS = 256                 # max in-kernel row slab for the streaming sum


@functools.lru_cache(maxsize=None)
def _tpu_config():
    """Returns (num_tensorcores_to_split_over, vmem_capacity_bytes)."""
    cores = 1
    vmem_cap = 128 << 20
    try:
        info = pltpu.get_tpu_info()
        vmem_cap = int(getattr(info, "vmem_capacity_bytes", vmem_cap))
        for name in ("num_cores", "num_tensorcores", "core_count",
                     "num_cores_per_chip", "tensorcore_count"):
            v = getattr(info, name, None)
            if isinstance(v, int) and v > 1:
                cores = int(v)
                break
    except Exception:
        pass
    if cores == 1:
        try:
            kind = jax.devices()[0].device_kind.lower()
            if "tpu" in kind and "7" in kind:     # v7x: 2 TensorCores / chip
                cores = 2
        except Exception:
            pass
    return min(cores, 2), vmem_cap


def _pick_tiling(b, d, itemsize, vmem_cap):
    """Row tile (multiple of 8, multiple of slab) + in-kernel slab size."""
    per_buf_budget = min(_TARGET_TILE_BYTES, max(512 << 10, vmem_cap // 16))
    tb = per_buf_budget // max(1, d * itemsize)
    tb = max(8, min(_MAX_TILE_ROWS, (tb // 8) * 8))
    b8 = -(-b // 8) * 8                          # batch rounded up to sublanes
    tb = min(tb, b8)
    # ~128 KiB of f32 live values per fori_loop iteration.
    slab = (128 << 10) // max(1, d * 4)
    slab = max(8, min(_SLAB_ROWS, (slab // 8) * 8, tb))
    tb = max(slab, (tb // slab) * slab)
    return tb, slab


def _make_colsum_kernel(b, tb, slab, tiles_per_core):
    """Masked streaming column-sum of `sample`, folded into an (8, D) partial.

    out_ref is a resident (1, 8, D) f32 accumulator per core (same output block
    across the trailing "arbitrary" batch-tile axis).
    """
    n_slabs = tb // slab

    def kernel(sample_ref, out_ref):
        c = pl.program_id(0)
        t = pl.program_id(1)

        @pl.when(t == 0)
        def _init():
            out_ref[...] = jnp.zeros_like(out_ref)

        # Un-clamped logical tile index.  The index_map clamps its block index,
        # so a fully out-of-range tile just re-fetches a valid block and is
        # skipped here via the `valid > 0` gate (contributes exactly 0).
        idx = c * tiles_per_core + t
        start = idx * tb
        valid = b - start                        # number of real rows this tile

        @pl.when(valid > 0)
        def _accumulate():
            d = sample_ref.shape[1]
            row_ids = lax.broadcasted_iota(jnp.int32, (slab, 1), 0)   # hoisted

            def body(k, acc):
                off = pl.multiple_of(k * slab, slab)
                s = sample_ref[pl.ds(off, slab), :].astype(jnp.float32)
                lim = valid - k * slab           # rows with index < lim are real
                s = jnp.where(row_ids < lim, s, 0.0)
                return acc + jnp.sum(s.reshape(slab // 8, 8, d), axis=0)

            rowsum8 = lax.fori_loop(0, n_slabs, body,
                                    jnp.zeros((8, d), jnp.float32))
            out_ref[...] += rowsum8[None]

    return kernel


@functools.partial(jax.jit, static_argnames=("margin",))
def triplet_loss(sample, posi, nega, margin=0.1):
    b, d = sample.shape
    posi = posi.reshape(1, d) if posi.ndim == 1 else posi
    nega = nega.reshape(1, d) if nega.ndim == 1 else nega
    assert posi.shape == (1, d) and nega.shape == (1, d), (
        "posi/nega must be (1, D) so repeat_interleave(., B, dim=0) matches sample")

    nc, vmem_cap = _tpu_config()
    tb, slab = _pick_tiling(b, d, sample.dtype.itemsize, vmem_cap)
    total_tiles = -(-b // tb)                    # ceil
    if total_tiles < 2:
        nc = 1                                   # nothing to split across cores
    tiles_per_core = -(-total_tiles // nc)
    last_tile = total_tiles - 1

    def sample_index_map(c, t):
        idx = c * tiles_per_core + t
        return (jnp.minimum(idx, last_tile), 0)  # clamp: never start past array

    if nc >= 2 and hasattr(pltpu, "CORE_PARALLEL"):
        dim_sems = (pltpu.CORE_PARALLEL, pltpu.ARBITRARY)   # shard across 2 TCs
    elif nc >= 2:
        dim_sems = ("parallel", "arbitrary")
    else:
        dim_sems = ("arbitrary", "arbitrary")

    tile_bytes = tb * d * sample.dtype.itemsize
    vmem_limit = int(min((40 << 20), max((16 << 20), 3 * tile_bytes + (4 << 20))))

    partials = pl.pallas_call(
        _make_colsum_kernel(b, tb, slab, tiles_per_core),
        out_shape=jax.ShapeDtypeStruct((nc, 8, d), jnp.float32),
        grid=(nc, tiles_per_core),
        in_specs=[pl.BlockSpec((tb, d), sample_index_map)],
        out_specs=pl.BlockSpec((1, 8, d), lambda c, t: (c, 0, 0)),
        compiler_params=pltpu.CompilerParams(
            dimension_semantics=dim_sems,
            vmem_limit_bytes=vmem_limit),
    )(sample)

    # Tiny O(D) epilogue (few fused XLA ops after the HBM-bound streaming pass):
    #   posi_dis - nega_dis = (-2*<colsum, p-n> + B*(|p|^2 - |n|^2)) / (B*D)
    # TODO(synk): for latency-critical tiny-B cases this could be fused in-kernel
    # on the last tile (XLU cross-lane reduce + SMEM scalar output).
    p32 = posi.astype(jnp.float32)[0]
    n32 = nega.astype(jnp.float32)[0]
    colsum = jnp.sum(partials, axis=(0, 1))      # (D,) total column sum of sample
    dot_total = jnp.sum(colsum * (p32 - n32))
    pp = jnp.sum(p32 * p32)
    nn = jnp.sum(n32 * n32)
    diff = (-2.0 * dot_total + b * (pp - nn)) / (b * d)
    return jnp.maximum(diff + jnp.float32(margin), jnp.float32(0.0))


def triplet_loss_ref(sample, posi, nega, margin=0.1):
    s = sample.astype(jnp.float32)
    posi_dis = jnp.mean((s - posi.astype(jnp.float32)) ** 2)
    nega_dis = jnp.mean((s - nega.astype(jnp.float32)) ** 2)
    return jnp.maximum(posi_dis - nega_dis + jnp.float32(margin), 0.0)


if __name__ == "__main__":
    key = jax.random.PRNGKey(0)
    k1, k2, k3 = jax.random.split(key, 3)

    # Small, module-consistent shapes.
    B, D = 8, 128
    sample = jax.random.normal(k1, (B, D), dtype=jnp.float32)
    posi = jax.random.normal(k2, (1, D), dtype=jnp.float32)
    nega = jax.random.normal(k3, (1, D), dtype=jnp.float32)

    out = jax.block_until_ready(triplet_loss(sample, posi, nega, margin=0.1))
    ref = triplet_loss_ref(sample, posi, nega, margin=0.1)
    assert jnp.allclose(out, ref, atol=1e-5, rtol=1e-4), (out, ref)

    # Non-tile-aligned batch: exercises the in-kernel tail mask + multi-tile grid
    # (no jnp.pad HBM pre-pass anymore).
    k4, k5, k6 = jax.random.split(k3, 3)
    B2, D2 = 300, 256
    sample2 = jax.random.normal(k4, (B2, D2), dtype=jnp.float32)
    posi2 = jax.random.normal(k5, (1, D2), dtype=jnp.float32)
    nega2 = jax.random.normal(k6, (1, D2), dtype=jnp.float32)

    out2 = jax.block_until_ready(triplet_loss(sample2, posi2, nega2, margin=0.1))
    ref2 = triplet_loss_ref(sample2, posi2, nega2, margin=0.1)
    assert jnp.allclose(out2, ref2, atol=1e-5, rtol=1e-4), (out2, ref2)

    print("KERNEL_OK")
</pallas_src>

<mosaic_0001>
module attributes {stable_mosaic.version = 11 : i64} {
  func.func @kernel(%arg0: i32, %arg1: i32, %arg2: memref<8x128xf32, #tpu.memory_space<vmem>>, %arg3: memref<1x8x128xf32, #tpu.memory_space<vmem>>) attributes {dimension_semantics = [#tpu.dimension_semantics<arbitrary>, #tpu.dimension_semantics<arbitrary>], iteration_bounds = array<i64: 1, 1>, scalar_prefetch = 0 : i64, scratch_operands = 0 : i64, tpu.core_type = #tpu.core_type<tc>, window_params = [{transform_indices = @transform_0, window_bounds = array<i64: 8, 128>}, {transform_indices = @transform_1, window_bounds = array<i64: 1, 8, 128>}]} {
    %c0_i32 = arith.constant 0 : i32
    %0 = arith.cmpi eq, %arg1, %c0_i32 : i32
    %1 = arith.extui %0 : i1 to i32
    %c0_i32_0 = arith.constant 0 : i32
    %2 = arith.cmpi ne, %1, %c0_i32_0 : i32
    scf.if %2 {
      %cst = arith.constant 0.000000e+00 : f32
      %10 = vector.broadcast %cst : f32 to vector<1x8x128xf32>
      %c0 = arith.constant 0 : index
      %c0_4 = arith.constant 0 : index
      %c0_5 = arith.constant 0 : index
      %11 = vector.load %arg3[%c0, %c0_4, %c0_5] : memref<1x8x128xf32, #tpu.memory_space<vmem>>, vector<1x8x128xf32>
      tpu.vector_store %arg3[%c0, %c0_4, %c0_5], %10 {strides = array<i32>} : memref<1x8x128xf32, #tpu.memory_space<vmem>>, vector<1x8x128xf32>,
    } else {
    }
    %c1_i32 = arith.constant 1 : i32
    %3 = arith.muli %arg0, %c1_i32 : i32
    %4 = arith.addi %3, %arg1 : i32
    %c8_i32 = arith.constant 8 : i32
    %5 = arith.muli %4, %c8_i32 : i32
    %c8_i32_1 = arith.constant 8 : i32
    %6 = arith.subi %c8_i32_1, %5 : i32
    %c0_i32_2 = arith.constant 0 : i32
    %7 = arith.cmpi sgt, %6, %c0_i32_2 : i32
    %8 = arith.extui %7 : i1 to i32
    %c0_i32_3 = arith.constant 0 : i32
    %9 = arith.cmpi ne, %8, %c0_i32_3 : i32
    scf.if %9 {
      %10 = tpu.iota {dimensions = array<i32: 0>} : vector<8x1xi32>
      %cst = arith.constant 0.000000e+00 : f32
      %11 = vector.broadcast %cst : f32 to vector<8x128xf32>
      %c0_i32_4 = arith.constant 0 : i32
      %c8_i32_5 = arith.constant 8 : i32
      %12 = arith.muli %c0_i32_4, %c8_i32_5 : i32
      %13 = tpu.assume_multiple %12, 8 : i32
      %14 = arith.index_cast %13 : i32 to index
      %c0 = arith.constant 0 : index
      %15 = vector.load %arg2[%14, %c0] : memref<8x128xf32, #tpu.memory_space<vmem>>, vector<8x128xf32>
      %c8_i32_6 = arith.constant 8 : i32
      %16 = arith.muli %c0_i32_4, %c8_i32_6 : i32
      %17 = arith.subi %6, %16 : i32
      %18 = vector.broadcast %17 : i32 to vector<8x1xi32>
      %19 = arith.cmpi slt, %10, %18 : vector<8x1xi32>
      %cst_7 = arith.constant 0.000000e+00 : f32
      %20 = vector.shape_cast %19 : vector<8x1xi1> to vector<8x1xi1>
      %21 = vector.broadcast %20 : vector<8x1xi1> to vector<8x128xi1>
      %22 = vector.broadcast %cst_7 : f32 to vector<8x128xf32>
      %23 = arith.select %21, %15, %22 : vector<8x128xi1>, vector<8x128xf32>
      %24 = vector.shape_cast %23 : vector<8x128xf32> to vector<1x8x128xf32>
      %cst_8 = arith.constant dense<0.000000e+00> : vector<8x128xf32>
      %25 = vector.multi_reduction <add>, %24, %cst_8 [0] : vector<1x8x128xf32> to vector<8x128xf32>
      %26 = arith.addf %11, %25 : vector<8x128xf32>
      %c1_i32_9 = arith.constant 1 : i32
      %c0_10 = arith.constant 0 : index
      %c0_11 = arith.constant 0 : index
      %c0_12 = arith.constant 0 : index
      %27 = vector.load %arg3[%c0_10, %c0_11, %c0_12] : memref<1x8x128xf32, #tpu.memory_space<vmem>>, vector<1x8x128xf32>
      %28 = vector.shape_cast %26 : vector<8x128xf32> to vector<1x8x128xf32>
      %29 = arith.addf %27, %28 : vector<1x8x128xf32>
      %c0_13 = arith.constant 0 : index
      %c0_14 = arith.constant 0 : index
      %c0_15 = arith.constant 0 : index
      %30 = vector.load %arg3[%c0_13, %c0_14, %c0_15] : memref<1x8x128xf32, #tpu.memory_space<vmem>>, vector<1x8x128xf32>
      tpu.vector_store %arg3[%c0_13, %c0_14, %c0_15], %29 {strides = array<i32>} : memref<1x8x128xf32, #tpu.memory_space<vmem>>, vector<1x8x128xf32>,
    } else {
    }
    return
  }
  func.func @transform_0(%arg0: i32, %arg1: i32) -> (i32, i32) {
    %c1_i32 = arith.constant 1 : i32
    %0 = arith.muli %arg0, %c1_i32 : i32
    %1 = arith.addi %0, %arg1 : i32
    %c0_i32 = arith.constant 0 : i32
    %2 = arith.minsi %1, %c0_i32 : i32
    %c0_i32_0 = arith.constant 0 : i32
    %c0_i32_1 = arith.constant 0 : i32
    return %2, %c0_i32_0 : i32, i32
  }
  func.func @transform_1(%arg0: i32, %arg1: i32) -> (i32, i32, i32) {
    %c0_i32 = arith.constant 0 : i32
    %c0_i32_0 = arith.constant 0 : i32
    %c0_i32_1 = arith.constant 0 : i32
    return %arg0, %c0_i32, %c0_i32_0 : i32, i32, i32
  }
}

</mosaic_0001>

<bundles_post_ra>
// kernel: triplet_loss.1
= control target key start
LH: loop header
LB: loop body
LE: loop exit
PB: predicated region body
PF: predicated region fallthrough
CT: control target
= control target key end

     0   :  { %6 = vsyncpa [#allocation3], 0  ;;  %s90_s9 = smov [#allocation2]   ;;  %s107_s0 = inlined_call_operand.hbm [shape: f32[8,128], index: 0, kind: input, shape index: {}]   ;;  %s108_s1 = inlined_call_operand.vmem [shape: f32[1,8,128], index: 1, kind: output, shape index: {}]  }
   0x1   :  { %s17_s8 = sshll.u32 %s107_s0, 4  ;;  %s19_s10 = sshll.u32 %s90_s9, 4  ;;  %s18_s8 = int_to_ptr.hbm [resolvable:$true] %s17_s8  ;;  %s20_s10 = int_to_ptr.vmem [resolvable:$true] %s19_s10 }
   0x2   :  { %22 = dma.hbm_to_vmem [thread:$0]  %s18_s8, 128, %s20_s10, [#allocation3]  }
   0x3   :  { %88 = dma.done.wait [#allocation3], 128  }
   0x4   :  { %89 = vsyncadd [#allocation3], 4294967168  ;;  %v44_v0 = vld [vmem:[#allocation2] sm:$0xff] }
   0x5   :  { %54 = vst [vmem:[%s108_s1] sm:$0xff] %v44_v0 }
   0x6   :  { %59 = vsyncpa [#allocation3], 1 }

</bundles_post_ra>
